<compile_context>
chip_gen: v7x
topology: tpu7x:2x2x1
jax: 0.10.0
libtpu: 0.0.40
codegen_flags: <defaults>
</compile_context>

<pallas_src>
import jax
import jax.numpy as jnp
from jax import lax
from jax.experimental import pallas as pl
from jax.experimental.pallas import tpu as pltpu

# ----------------------------- model sizes -----------------------------------
B = 2            # batch of graphs
W_DIM = 16       # config.weight_dim == nodes (and hyperedges) per graph
IN_DIM = 8       # input_dim
H1, H2, H3 = 16, 16, 32
OUT_DIM = 4

BW = B * W_DIM                      # 32: both graphs, block-diagonal layout
LANES = max(BW, H1, H2, H3)         # 32: common padded lane width for params/activations


def _build_param_layout():
    """Static row layout of the single packed parameter slab (LANES wide)."""
    layout, off = {}, 0

    def add(name, rows):
        nonlocal off
        layout[name] = off
        off += -(-rows // 8) * 8          # 8-sublane aligned slots

    add("w_lap", 1)          # weight_lap tiled to (1, BW)
    add("conv0_w", IN_DIM)   # (IN_DIM, H1)  zero-padded cols to LANES
    add("conv0_b", 1)
    add("conv1_w", LANES)    # (H1, H2)      zero-padded to (LANES, LANES)
    add("conv1_b", 1)
    add("conv2_w", LANES)    # (H2, H3)      zero-padded to (LANES, LANES)
    add("conv2_b", 1)
    add("mlp1_w", LANES)     # (H3, H3)
    add("mlp1_b", 1)
    add("mlp2_w", LANES)     # (H3, OUT)     zero-padded cols
    add("mlp2_b", 1)
    return layout, off


P_OFF, P_ROWS = _build_param_layout()


# --------------------- fused forward kernel (grid = ()) -----------------------
def fused_forward_kernel(p_ref, hb_ref, deb_ref, x_ref, l_ref, emb_ref, logp_ref):
    nb = logp_ref.shape[0]            # number of graphs
    BWk = l_ref.shape[0]              # B * W_DIM (block-diagonal layout)
    N = BWk // nb                     # nodes per graph

    def pslab(name, rows):            # static, 8-aligned slice of the packed params
        off = P_OFF[name]
        return p_ref[off:off + rows, :]

    # ---- Laplacian:  L = D^-1/2 (H diag|w|) (De H^T) D^-1/2  (per-graph blocks) ----
    w_abs = jnp.abs(pslab("w_lap", 1))            # (1, BW)  |weight_lap| tiled per graph
    Hb = hb_ref[...]                              # (BW, BW) block-diagonal H
    Deb = deb_ref[...]                            # (BW, BW) block-diagonal De
    HM = Hb * w_abs                               # H @ diag(|w|)
    s = jnp.sum(HM, axis=-1, keepdims=True)       # (BW,1) = H @ |w|
    d_inv = lax.rsqrt(s)         # no zero guard, matches reference (positive inputs)
    left = d_inv * HM                             # D^-1/2 H diag|w|
    Hd = Hb * d_inv
    # rightT = Hd @ De^T  == (De @ H^T @ D^-1/2)^T   (contract last axes -> no transpose)
    rightT = lax.dot_general(Hd, Deb, (((1,), (1,)), ((), ())),
                             preferred_element_type=jnp.float32)
    Lb = lax.dot_general(left, rightT, (((1,), (1,)), ((), ())),
                         preferred_element_type=jnp.float32)          # L
    LTb = lax.dot_general(rightT, left, (((1,), (1,)), ((), ())),
                          preferred_element_type=jnp.float32)         # L^T
    l_ref[...] = Lb                               # full lane-dense slab store

    # ---- dense_to_sparse(L) + GCNConv self-loops: zero diagonal -> weight-1 loop ----
    row = lax.broadcasted_iota(jnp.int32, (BWk, BWk), 0)
    col = lax.broadcasted_iota(jnp.int32, (BWk, BWk), 1)
    eye = row == col
    A = jnp.where(eye & (Lb == 0.0), 1.0, Lb)     # adjacency with self-loops
    AT = jnp.where(eye & (LTb == 0.0), 1.0, LTb)  # its transpose (propagation form)

    # ---- gcn_norm folded ONCE into the propagation matrix: ATn = dis_i * A^T * dis_j ----
    deg = jnp.sum(AT, axis=-1, keepdims=True)         # (BW,1)  column sums of A
    dis_col = jnp.where(deg == 0.0, 0.0, lax.rsqrt(deg))
    deg_r = jnp.sum(A, axis=0, keepdims=True)         # same values, row layout (1,BW)
    dis_row = jnp.where(deg_r == 0.0, 0.0, lax.rsqrt(deg_r))
    ATn = dis_col * AT * dis_row                      # normalized adjacency (transposed)

    # ---- 3 GCNConv layers, both graphs in one (BW, LANES) slab, zero-padded lanes ----
    h = x_ref[...]                                    # (BW, IN_DIM)
    emb = None
    for w_name, b_name, krows in (("conv0_w", "conv0_b", IN_DIM),
                                  ("conv1_w", "conv1_b", LANES),
                                  ("conv2_w", "conv2_b", LANES)):
        xw = jnp.dot(h, pslab(w_name, krows), preferred_element_type=jnp.float32)
        pre = jnp.dot(ATn, xw, preferred_element_type=jnp.float32) + pslab(b_name, 1)
        emb = pre                                     # conv output before ReLU
        h = jnp.maximum(pre, 0.0)                     # F.relu
        # TODO(synk): F.dropout(p=0.25, training=True) skipped — eval mode (identity).
    emb_ref[...] = emb[:, :emb_ref.shape[1]]          # full (BW, H3) lane-dense store

    # ---- global_mean_pool + post_mp + log_softmax ----
    gid = lax.broadcasted_iota(jnp.int32, (nb, BWk), 1)   # global node index
    bid = lax.broadcasted_iota(jnp.int32, (nb, BWk), 0)   # graph index
    pool = jnp.where((gid >= bid * N) & (gid < (bid + 1) * N), 1.0 / N, 0.0)
    pooled = jnp.dot(pool, h, preferred_element_type=jnp.float32)            # (nb, LANES)
    hidden = jnp.dot(pooled, pslab("mlp1_w", LANES),
                     preferred_element_type=jnp.float32) + pslab("mlp1_b", 1)
    # TODO(synk): Dropout(0.25) inside post_mp skipped — eval mode (identity).
    logits = jnp.dot(hidden, pslab("mlp2_w", LANES),
                     preferred_element_type=jnp.float32) + pslab("mlp2_b", 1)
    logits = logits[:, :logp_ref.shape[1]]            # drop zero-padded output lanes
    zc = logits - jnp.max(logits, axis=-1, keepdims=True)
    logp_ref[...] = zc - jnp.log(jnp.sum(jnp.exp(zc), axis=-1, keepdims=True))


# ------------------------------- wrapper --------------------------------------
def _block_diag(M):
    """(B, N, N) -> (B*N, B*N) block-diagonal (XLA-side layout plumbing)."""
    Bsz, N, _ = M.shape
    eyeB = jnp.eye(Bsz, dtype=M.dtype)
    return (eyeB[:, None, :, None] * M[:, :, None, :]).reshape(Bsz * N, Bsz * N)


def _pack_params(params, Bsz, N):
    """Pack all parameters into one (P_ROWS, LANES) f32 slab (layout plumbing only)."""
    buf = jnp.zeros((P_ROWS, LANES), jnp.float32)

    def put(b, name, a):
        r, c = a.shape
        return b.at[P_OFF[name]:P_OFF[name] + r, :c].set(a.astype(jnp.float32))

    w_tiled = jnp.tile(params["weight_lap"], Bsz).reshape(1, Bsz * N)
    buf = put(buf, "w_lap", w_tiled)
    buf = put(buf, "conv0_w", params["conv0_w"]); buf = put(buf, "conv0_b", params["conv0_b"])
    buf = put(buf, "conv1_w", params["conv1_w"]); buf = put(buf, "conv1_b", params["conv1_b"])
    buf = put(buf, "conv2_w", params["conv2_w"]); buf = put(buf, "conv2_b", params["conv2_b"])
    buf = put(buf, "mlp1_w", params["mlp1_w"]);   buf = put(buf, "mlp1_b", params["mlp1_b"])
    buf = put(buf, "mlp2_w", params["mlp2_w"]);   buf = put(buf, "mlp2_b", params["mlp2_b"])
    return buf


def laplacian_gcn_forward(params, x, H, De):
    Bsz, N, _ = H.shape
    BWl = Bsz * N
    h3 = params["conv2_w"].shape[1]
    out_dim = params["mlp2_w"].shape[1]

    # Layout plumbing only (no compute hoisted out of the kernel).
    packed = _pack_params(params, Bsz, N)       # 1 DMA instead of 11
    Hb = _block_diag(H)
    Deb = _block_diag(De)
    xf = x.reshape(BWl, -1)

    vmem = pl.BlockSpec(memory_space=pltpu.MemorySpace.VMEM)
    Lfull, embf, logp = pl.pallas_call(
        fused_forward_kernel,
        out_shape=(jax.ShapeDtypeStruct((BWl, BWl), jnp.float32),
                   jax.ShapeDtypeStruct((BWl, h3), jnp.float32),
                   jax.ShapeDtypeStruct((Bsz, out_dim), jnp.float32)),
        in_specs=[vmem, vmem, vmem, vmem],
        out_specs=(vmem, vmem, vmem),
    )(packed, Hb, Deb, xf)

    # Extract per-graph views outside the kernel (XLA-side slices / free reshape).
    L = jnp.stack([Lfull[b * N:(b + 1) * N, b * N:(b + 1) * N] for b in range(Bsz)])
    emb = embf.reshape(Bsz, N, h3)
    return emb, logp, params["weight_lap"], L


# ------------------------------ pure-JAX reference ------------------------------
def reference_forward(params, x, H, De):
    w_abs = jnp.abs(params["weight_lap"])
    d_inv = 1.0 / jnp.sqrt(jnp.einsum("bij,j->bi", H, w_abs))
    HM = H * w_abs[None, None, :]
    DeHT = jnp.einsum("bij,bkj->bik", De, H)
    L = jnp.einsum("bi,bij,bjk,bk->bik", d_inv, HM, DeHT, d_inv)
    eye = jnp.eye(H.shape[1], dtype=bool)[None]
    A = jnp.where(eye & (L == 0.0), 1.0, L)
    deg = jnp.sum(A, axis=1)                                   # column sums
    dis = jnp.where(deg == 0.0, 0.0, 1.0 / jnp.sqrt(deg))
    h = x
    for i in range(3):
        XW = jnp.einsum("bnf,fo->bno", h, params[f"conv{i}_w"])
        out = jnp.einsum("bc,brc,br,bro->bco", dis, A, dis, XW) + params[f"conv{i}_b"]
        emb = out
        h = jnp.maximum(out, 0.0)
    pooled = jnp.mean(h, axis=1)
    z = pooled @ params["mlp1_w"] + params["mlp1_b"]
    logits = z @ params["mlp2_w"] + params["mlp2_b"]
    return emb, jax.nn.log_softmax(logits, axis=1), params["weight_lap"], L


# ------------------------------------ main --------------------------------------
if __name__ == "__main__":
    key = jax.random.PRNGKey(0)
    ks = jax.random.split(key, 12)

    def glorot(k, fin, fout):
        lim = (6.0 / (fin + fout)) ** 0.5
        return jax.random.uniform(k, (fin, fout), jnp.float32, -lim, lim)

    params = {
        "weight_lap": jax.random.uniform(ks[0], (W_DIM,), jnp.float32),   # uniform_ init
        "conv0_w": glorot(ks[1], IN_DIM, H1), "conv0_b": jnp.zeros((1, H1), jnp.float32),
        "conv1_w": glorot(ks[2], H1, H2),     "conv1_b": jnp.zeros((1, H2), jnp.float32),
        "conv2_w": glorot(ks[3], H2, H3),     "conv2_b": jnp.zeros((1, H3), jnp.float32),
        "mlp1_w": glorot(ks[4], H3, H3),
        "mlp1_b": jax.random.uniform(ks[5], (1, H3), jnp.float32, -0.1, 0.1),
        "mlp2_w": glorot(ks[6], H3, OUT_DIM),
        "mlp2_b": jax.random.uniform(ks[7], (1, OUT_DIM), jnp.float32, -0.1, 0.1),
    }

    x = jax.random.normal(ks[8], (B, W_DIM, IN_DIM), jnp.float32)
    H = jax.random.uniform(ks[9], (B, W_DIM, W_DIM), jnp.float32, 0.1, 1.0)   # nonneg
    De = jax.random.uniform(ks[10], (B, W_DIM, W_DIM), jnp.float32, 0.1, 1.0)

    fwd = jax.jit(laplacian_gcn_forward)
    emb, logp, w_lap, L = fwd(params, x, H, De)
    jax.block_until_ready((emb, logp, w_lap, L))

    emb_r, logp_r, _, L_r = jax.jit(reference_forward)(params, x, H, De)
    assert jnp.max(jnp.abs(L - L_r)) < 1e-2
    assert jnp.max(jnp.abs(emb - emb_r)) < 1e-2
    assert jnp.max(jnp.abs(logp - logp_r)) < 1e-2

    print("KERNEL_OK")
</pallas_src>

<mosaic_0001>
module attributes {stable_mosaic.version = 11 : i64} {
  func.func @fused_forward_kernel(%arg0: memref<184x32xf32, #tpu.memory_space<vmem>>, %arg1: memref<32x32xf32, #tpu.memory_space<vmem>>, %arg2: memref<32x32xf32, #tpu.memory_space<vmem>>, %arg3: memref<32x8xf32, #tpu.memory_space<vmem>>, %arg4: memref<32x32xf32, #tpu.memory_space<vmem>>, %arg5: memref<32x32xf32, #tpu.memory_space<vmem>>, %arg6: memref<2x4xf32, #tpu.memory_space<vmem>>) attributes {dimension_semantics = [], scalar_prefetch = 0 : i64, scratch_operands = 0 : i64, tpu.core_type = #tpu.core_type<tc>} {
    %c0 = arith.constant 0 : index
    %c0_0 = arith.constant 0 : index
    %0 = vector.load %arg0[%c0, %c0_0] : memref<184x32xf32, #tpu.memory_space<vmem>>, vector<1x32xf32>
    %1 = math.absf %0 : vector<1x32xf32>
    %c0_1 = arith.constant 0 : index
    %c0_2 = arith.constant 0 : index
    %2 = vector.load %arg1[%c0_1, %c0_2] : memref<32x32xf32, #tpu.memory_space<vmem>>, vector<32x32xf32>
    %c0_3 = arith.constant 0 : index
    %c0_4 = arith.constant 0 : index
    %3 = vector.load %arg2[%c0_3, %c0_4] : memref<32x32xf32, #tpu.memory_space<vmem>>, vector<32x32xf32>
    %4 = vector.broadcast %1 : vector<1x32xf32> to vector<32x32xf32>
    %5 = arith.mulf %2, %4 : vector<32x32xf32>
    %cst = arith.constant dense<0.000000e+00> : vector<32xf32>
    %6 = vector.multi_reduction <add>, %5, %cst [1] : vector<32x32xf32> to vector<32xf32>
    %7 = vector.shape_cast %6 : vector<32xf32> to vector<32x1xf32>
    %8 = math.rsqrt %7 : vector<32x1xf32>
    %9 = vector.broadcast %8 : vector<32x1xf32> to vector<32x32xf32>
    %10 = arith.mulf %9, %5 : vector<32x32xf32>
    %11 = vector.broadcast %8 : vector<32x1xf32> to vector<32x32xf32>
    %12 = arith.mulf %2, %11 : vector<32x32xf32>
    %cst_5 = arith.constant dense<0.000000e+00> : vector<32x32xf32>
    %13 = tpu.matmul %12, %3, %cst_5 {dimension_numbers = #tpu.dot_dimension_numbers<[1], [1], [0], [0], [0, 0, 1, 0], [], []>} : vector<32x32xf32>, vector<32x32xf32>, vector<32x32xf32> -> vector<32x32xf32>
    %cst_6 = arith.constant dense<0.000000e+00> : vector<32x32xf32>
    %14 = tpu.matmul %10, %13, %cst_6 {dimension_numbers = #tpu.dot_dimension_numbers<[1], [1], [0], [0], [0, 0, 1, 0], [], []>} : vector<32x32xf32>, vector<32x32xf32>, vector<32x32xf32> -> vector<32x32xf32>
    %cst_7 = arith.constant dense<0.000000e+00> : vector<32x32xf32>
    %15 = tpu.matmul %13, %10, %cst_7 {dimension_numbers = #tpu.dot_dimension_numbers<[1], [1], [0], [0], [0, 0, 1, 0], [], []>} : vector<32x32xf32>, vector<32x32xf32>, vector<32x32xf32> -> vector<32x32xf32>
    %c0_8 = arith.constant 0 : index
    %c0_9 = arith.constant 0 : index
    %16 = vector.load %arg4[%c0_8, %c0_9] : memref<32x32xf32, #tpu.memory_space<vmem>>, vector<32x32xf32>
    tpu.vector_store %arg4[%c0_8, %c0_9], %14 {strides = array<i32>} : memref<32x32xf32, #tpu.memory_space<vmem>>, vector<32x32xf32>,
    %17 = tpu.iota {dimensions = array<i32: 0>} : vector<32x32xi32>
    %18 = tpu.iota {dimensions = array<i32: 1>} : vector<32x32xi32>
    %19 = arith.cmpi eq, %17, %18 : vector<32x32xi32>
    %cst_10 = arith.constant 0.000000e+00 : f32
    %20 = vector.broadcast %cst_10 : f32 to vector<32x32xf32>
    %21 = arith.cmpf oeq, %14, %20 : vector<32x32xf32>
    %22 = arith.andi %19, %21 : vector<32x32xi1>
    %cst_11 = arith.constant 1.000000e+00 : f32
    %23 = vector.broadcast %cst_11 : f32 to vector<32x32xf32>
    %24 = arith.select %22, %23, %14 : vector<32x32xi1>, vector<32x32xf32>
    %cst_12 = arith.constant 0.000000e+00 : f32
    %25 = vector.broadcast %cst_12 : f32 to vector<32x32xf32>
    %26 = arith.cmpf oeq, %15, %25 : vector<32x32xf32>
    %27 = arith.andi %19, %26 : vector<32x32xi1>
    %cst_13 = arith.constant 1.000000e+00 : f32
    %28 = vector.broadcast %cst_13 : f32 to vector<32x32xf32>
    %29 = arith.select %27, %28, %15 : vector<32x32xi1>, vector<32x32xf32>
    %cst_14 = arith.constant dense<0.000000e+00> : vector<32xf32>
    %30 = vector.multi_reduction <add>, %29, %cst_14 [1] : vector<32x32xf32> to vector<32xf32>
    %31 = vector.shape_cast %30 : vector<32xf32> to vector<32x1xf32>
    %cst_15 = arith.constant 0.000000e+00 : f32
    %32 = vector.broadcast %cst_15 : f32 to vector<32x1xf32>
    %33 = arith.cmpf oeq, %31, %32 : vector<32x1xf32>
    %34 = math.rsqrt %31 : vector<32x1xf32>
    %cst_16 = arith.constant 0.000000e+00 : f32
    %35 = vector.broadcast %cst_16 : f32 to vector<32x1xf32>
    %36 = arith.select %33, %35, %34 : vector<32x1xi1>, vector<32x1xf32>
    %cst_17 = arith.constant dense<0.000000e+00> : vector<32xf32>
    %37 = vector.multi_reduction <add>, %24, %cst_17 [0] : vector<32x32xf32> to vector<32xf32>
    %38 = vector.shape_cast %37 : vector<32xf32> to vector<1x32xf32>
    %cst_18 = arith.constant 0.000000e+00 : f32
    %39 = vector.broadcast %cst_18 : f32 to vector<1x32xf32>
    %40 = arith.cmpf oeq, %38, %39 : vector<1x32xf32>
    %41 = math.rsqrt %38 : vector<1x32xf32>
    %cst_19 = arith.constant 0.000000e+00 : f32
    %42 = vector.broadcast %cst_19 : f32 to vector<1x32xf32>
    %43 = arith.select %40, %42, %41 : vector<1x32xi1>, vector<1x32xf32>
    %44 = vector.broadcast %36 : vector<32x1xf32> to vector<32x32xf32>
    %45 = arith.mulf %44, %29 : vector<32x32xf32>
    %46 = vector.broadcast %43 : vector<1x32xf32> to vector<32x32xf32>
    %47 = arith.mulf %45, %46 : vector<32x32xf32>
    %c0_20 = arith.constant 0 : index
    %c0_21 = arith.constant 0 : index
    %48 = vector.load %arg3[%c0_20, %c0_21] : memref<32x8xf32, #tpu.memory_space<vmem>>, vector<32x8xf32>
    %c8 = arith.constant 8 : index
    %c0_22 = arith.constant 0 : index
    %49 = vector.load %arg0[%c8, %c0_22] : memref<184x32xf32, #tpu.memory_space<vmem>>, vector<8x32xf32>
    %cst_23 = arith.constant dense<0.000000e+00> : vector<32x32xf32>
    %50 = tpu.matmul %48, %49, %cst_23 {dimension_numbers = #tpu.dot_dimension_numbers<[1], [0], [0], [1], [0, 0, 1, 1], [], []>} : vector<32x8xf32>, vector<8x32xf32>, vector<32x32xf32> -> vector<32x32xf32>
    %cst_24 = arith.constant dense<0.000000e+00> : vector<32x32xf32>
    %51 = tpu.matmul %47, %50, %cst_24 {dimension_numbers = #tpu.dot_dimension_numbers<[1], [0], [0], [1], [0, 0, 1, 1], [], []>} : vector<32x32xf32>, vector<32x32xf32>, vector<32x32xf32> -> vector<32x32xf32>
    %c16 = arith.constant 16 : index
    %c0_25 = arith.constant 0 : index
    %52 = vector.load %arg0[%c16, %c0_25] : memref<184x32xf32, #tpu.memory_space<vmem>>, vector<1x32xf32>
    %53 = vector.broadcast %52 : vector<1x32xf32> to vector<32x32xf32>
    %54 = arith.addf %51, %53 : vector<32x32xf32>
    %cst_26 = arith.constant 0.000000e+00 : f32
    %55 = vector.broadcast %cst_26 : f32 to vector<32x32xf32>
    %56 = arith.maximumf %54, %55 : vector<32x32xf32>
    %c24 = arith.constant 24 : index
    %c0_27 = arith.constant 0 : index
    %57 = vector.load %arg0[%c24, %c0_27] : memref<184x32xf32, #tpu.memory_space<vmem>>, vector<32x32xf32>
    %cst_28 = arith.constant dense<0.000000e+00> : vector<32x32xf32>
    %58 = tpu.matmul %56, %57, %cst_28 {dimension_numbers = #tpu.dot_dimension_numbers<[1], [0], [0], [1], [0, 0, 1, 1], [], []>} : vector<32x32xf32>, vector<32x32xf32>, vector<32x32xf32> -> vector<32x32xf32>
    %cst_29 = arith.constant dense<0.000000e+00> : vector<32x32xf32>
    %59 = tpu.matmul %47, %58, %cst_29 {dimension_numbers = #tpu.dot_dimension_numbers<[1], [0], [0], [1], [0, 0, 1, 1], [], []>} : vector<32x32xf32>, vector<32x32xf32>, vector<32x32xf32> -> vector<32x32xf32>
    %c56 = arith.constant 56 : index
    %c0_30 = arith.constant 0 : index
    %60 = vector.load %arg0[%c56, %c0_30] : memref<184x32xf32, #tpu.memory_space<vmem>>, vector<1x32xf32>
    %61 = vector.broadcast %60 : vector<1x32xf32> to vector<32x32xf32>
    %62 = arith.addf %59, %61 : vector<32x32xf32>
    %cst_31 = arith.constant 0.000000e+00 : f32
    %63 = vector.broadcast %cst_31 : f32 to vector<32x32xf32>
    %64 = arith.maximumf %62, %63 : vector<32x32xf32>
    %c64 = arith.constant 64 : index
    %c0_32 = arith.constant 0 : index
    %65 = vector.load %arg0[%c64, %c0_32] : memref<184x32xf32, #tpu.memory_space<vmem>>, vector<32x32xf32>
    %cst_33 = arith.constant dense<0.000000e+00> : vector<32x32xf32>
    %66 = tpu.matmul %64, %65, %cst_33 {dimension_numbers = #tpu.dot_dimension_numbers<[1], [0], [0], [1], [0, 0, 1, 1], [], []>} : vector<32x32xf32>, vector<32x32xf32>, vector<32x32xf32> -> vector<32x32xf32>
    %cst_34 = arith.constant dense<0.000000e+00> : vector<32x32xf32>
    %67 = tpu.matmul %47, %66, %cst_34 {dimension_numbers = #tpu.dot_dimension_numbers<[1], [0], [0], [1], [0, 0, 1, 1], [], []>} : vector<32x32xf32>, vector<32x32xf32>, vector<32x32xf32> -> vector<32x32xf32>
    %c96 = arith.constant 96 : index
    %c0_35 = arith.constant 0 : index
    %68 = vector.load %arg0[%c96, %c0_35] : memref<184x32xf32, #tpu.memory_space<vmem>>, vector<1x32xf32>
    %69 = vector.broadcast %68 : vector<1x32xf32> to vector<32x32xf32>
    %70 = arith.addf %67, %69 : vector<32x32xf32>
    %cst_36 = arith.constant 0.000000e+00 : f32
    %71 = vector.broadcast %cst_36 : f32 to vector<32x32xf32>
    %72 = arith.maximumf %70, %71 : vector<32x32xf32>
    %c0_37 = arith.constant 0 : index
    %c0_38 = arith.constant 0 : index
    %73 = vector.load %arg5[%c0_37, %c0_38] : memref<32x32xf32, #tpu.memory_space<vmem>>, vector<32x32xf32>
    tpu.vector_store %arg5[%c0_37, %c0_38], %70 {strides = array<i32>} : memref<32x32xf32, #tpu.memory_space<vmem>>, vector<32x32xf32>,
    %74 = tpu.iota {dimensions = array<i32: 1>} : vector<2x32xi32>
    %75 = tpu.iota {dimensions = array<i32: 0>} : vector<2x32xi32>
    %c16_i32 = arith.constant 16 : i32
    %76 = vector.broadcast %c16_i32 : i32 to vector<2x32xi32>
    %77 = arith.muli %75, %76 : vector<2x32xi32>
    %78 = arith.cmpi sge, %74, %77 : vector<2x32xi32>
    %c1_i32 = arith.constant 1 : i32
    %79 = vector.broadcast %c1_i32 : i32 to vector<2x32xi32>
    %80 = arith.addi %75, %79 : vector<2x32xi32>
    %c16_i32_39 = arith.constant 16 : i32
    %81 = vector.broadcast %c16_i32_39 : i32 to vector<2x32xi32>
    %82 = arith.muli %80, %81 : vector<2x32xi32>
    %83 = arith.cmpi slt, %74, %82 : vector<2x32xi32>
    %84 = arith.andi %78, %83 : vector<2x32xi1>
    %cst_40 = arith.constant 6.250000e-02 : f32
    %cst_41 = arith.constant 0.000000e+00 : f32
    %85 = vector.broadcast %cst_40 : f32 to vector<2x32xf32>
    %86 = vector.broadcast %cst_41 : f32 to vector<2x32xf32>
    %87 = arith.select %84, %85, %86 : vector<2x32xi1>, vector<2x32xf32>
    %cst_42 = arith.constant dense<0.000000e+00> : vector<2x32xf32>
    %88 = tpu.matmul %87, %72, %cst_42 {dimension_numbers = #tpu.dot_dimension_numbers<[1], [0], [0], [1], [0, 0, 1, 1], [], []>} : vector<2x32xf32>, vector<32x32xf32>, vector<2x32xf32> -> vector<2x32xf32>
    %c104 = arith.constant 104 : index
    %c0_43 = arith.constant 0 : index
    %89 = vector.load %arg0[%c104, %c0_43] : memref<184x32xf32, #tpu.memory_space<vmem>>, vector<32x32xf32>
    %cst_44 = arith.constant dense<0.000000e+00> : vector<2x32xf32>
    %90 = tpu.matmul %88, %89, %cst_44 {dimension_numbers = #tpu.dot_dimension_numbers<[1], [0], [0], [1], [0, 0, 1, 1], [], []>} : vector<2x32xf32>, vector<32x32xf32>, vector<2x32xf32> -> vector<2x32xf32>
    %c136 = arith.constant 136 : index
    %c0_45 = arith.constant 0 : index
    %91 = vector.load %arg0[%c136, %c0_45] : memref<184x32xf32, #tpu.memory_space<vmem>>, vector<1x32xf32>
    %92 = vector.broadcast %91 : vector<1x32xf32> to vector<2x32xf32>
    %93 = arith.addf %90, %92 : vector<2x32xf32>
    %c144 = arith.constant 144 : index
    %c0_46 = arith.constant 0 : index
    %94 = vector.load %arg0[%c144, %c0_46] : memref<184x32xf32, #tpu.memory_space<vmem>>, vector<32x32xf32>
    %cst_47 = arith.constant dense<0.000000e+00> : vector<2x32xf32>
    %95 = tpu.matmul %93, %94, %cst_47 {dimension_numbers = #tpu.dot_dimension_numbers<[1], [0], [0], [1], [0, 0, 1, 1], [], []>} : vector<2x32xf32>, vector<32x32xf32>, vector<2x32xf32> -> vector<2x32xf32>
    %c176 = arith.constant 176 : index
    %c0_48 = arith.constant 0 : index
    %96 = vector.load %arg0[%c176, %c0_48] : memref<184x32xf32, #tpu.memory_space<vmem>>, vector<1x32xf32>
    %97 = vector.broadcast %96 : vector<1x32xf32> to vector<2x32xf32>
    %98 = arith.addf %95, %97 : vector<2x32xf32>
    %99 = vector.extract_strided_slice %98 {offsets = [0, 0], sizes = [2, 4], strides = [1, 1]} : vector<2x32xf32> to vector<2x4xf32>
    %cst_49 = arith.constant dense<0xFF800000> : vector<2xf32>
    %100 = vector.multi_reduction <maximumf>, %99, %cst_49 [1] : vector<2x4xf32> to vector<2xf32>
    %101 = vector.shape_cast %100 : vector<2xf32> to vector<2x1xf32>
    %102 = vector.broadcast %101 : vector<2x1xf32> to vector<2x4xf32>
    %103 = arith.subf %99, %102 : vector<2x4xf32>
    %104 = math.exp %103 : vector<2x4xf32>
    %cst_50 = arith.constant dense<0.000000e+00> : vector<2xf32>
    %105 = vector.multi_reduction <add>, %104, %cst_50 [1] : vector<2x4xf32> to vector<2xf32>
    %106 = vector.shape_cast %105 : vector<2xf32> to vector<2x1xf32>
    %107 = math.log %106 : vector<2x1xf32>
    %108 = vector.broadcast %107 : vector<2x1xf32> to vector<2x4xf32>
    %109 = arith.subf %103, %108 : vector<2x4xf32>
    %c0_51 = arith.constant 0 : index
    %c0_52 = arith.constant 0 : index
    %110 = vector.load %arg6[%c0_51, %c0_52] : memref<2x4xf32, #tpu.memory_space<vmem>>, vector<2x4xf32>
    tpu.vector_store %arg6[%c0_51, %c0_52], %109 {strides = array<i32>} : memref<2x4xf32, #tpu.memory_space<vmem>>, vector<2x4xf32>,
    return
  }
}

</mosaic_0001>

<bundles_post_ra>
// kernel: tile.8
= control target key start
LH: loop header
LB: loop body
LE: loop exit
PB: predicated region body
PF: predicated region fallthrough
CT: control target
= control target key end

     0   :  { %s22_s0 = inlined_call_operand.vmem [shape: f32[16], index: 0, kind: input, shape index: {}]   ;;  %s23_s1 = inlined_call_operand.vmem [shape: f32[2,16], index: 1, kind: output, shape index: {}]  }
   0x1   :  { %v4_v0 = vld [vmem:[%s22_s0] ss:$0 sm:$0xff] }
   0x2   :  { %5 = vst [vmem:[%s23_s1] sm:$0x3] %v4_v0 }

// kernel: laplacian_gcn_forward.1
= control target key start
LH: loop header
LB: loop body
LE: loop exit
PB: predicated region body
PF: predicated region fallthrough
CT: control target
= control target key end

     0   :  { %12 = vsyncpa [#allocation3], 0  ;;  %v32_v1 = vlaneseq  ;;  %s2156_s0 = inlined_call_operand.vmem [shape: f32[184,32], index: 0, kind: input, shape index: {}]   ;;  %s2157_s1 = inlined_call_operand.vmem [shape: f32[32,32], index: 1, kind: input, shape index: {}]   ;;  %s2158_s2 = inlined_call_operand.vmem [shape: f32[32,32], index: 2, kind: input, shape index: {}]   ;;  %s2159_s3 = inlined_call_operand.vmem [shape: f32[32,8], index: 3, kind: input, shape index: {}]   ;;  %s2160_s4 = inlined_call_operand.vmem [shape: f32[32,32], index: 4, kind: output, shape index: {0}]   ;;  %s2161_s5 = inlined_call_operand.hbm [shape: f32[32,32], index: 5, kind: output, shape index: {1}]   ;;  %s2162_s6 = inlined_call_operand.hbm [shape: f32[2,4], index: 6, kind: output, shape index: {2}]  }
   0x1   :  { %v22_v0 = vld [vmem:[%s2156_s0] sm:$0x1] }
   0x2   :  { %13 = vsyncpa [#allocation5], 0  ;;  %v23_v2 = vand.u32 2147483647, %v22_v0  ;;  %v1860_v3 = vshrl.u32 %v32_v1, 7  ;;  %v26_v4 = vld [vmem:[%s2157_s1 + $0x10] sm:$0xff] }
   0x3   :  { %v24_v6 = vld [vmem:[%s2157_s1] sm:$0xff]  ;;  %v27_v7 = vld [vmem:[%s2157_s1 + $0x18] sm:$0xff]  ;;  %v25_v8 = vld [vmem:[%s2157_s1 + $0x8] sm:$0xff]  ;;  %vm40_vm0 = vcmask 261120   ;;  %vm460_vm2 = vcmask 64512   ;;  %v1950_v55 = vand.u32 127, %v32_v1 }
   0x4   :  { %v34_v5 = vsub.s32 0, %v1860_v3  ;;  %v28_v18 = vld [vmem:[%s2158_s2] sm:$0xff]  ;;  %v29_v19 = vld [vmem:[%s2158_s2 + $0x8] sm:$0xff]  ;;  %vm1887_vm1 = vmpackc.low %vm40_vm0, %vm40_vm0  ;;  %v374_v54 = vadd.s32 8, %v1860_v3  ;;  %v376_v56 = vadd.s32 24, %v1860_v3  ;;  %v375_v58 = vadd.s32 16, %v1860_v3 }
   0x5   :  { %v1643_v20 = vpack.c.bf16 %v29_v19, %v28_v18  ;;  %v30_v22 = vld [vmem:[%s2158_s2 + $0x10] sm:$0xff]  ;;  %v31_v23 = vld [vmem:[%s2158_s2 + $0x18] sm:$0xff]  ;;  %v459_v49 = vld [vmem:[%s2156_s0 + $0x8] sm:$0xff]  ;;  %vm379_vm4 = vcmp.eq.s32.totalorder %v1860_v3, %v1950_v55  ;;  %s1817_s17 = smov [#allocation2]  }
   0x6   :  { %v35_v9 = vrot.slane %v23_v2, %v34_v5  ;;  %v1649_v24 = vpack.c.bf16 %v31_v23, %v30_v22  ;;  %v455_v50 = vld [vmem:[%s2159_s3] sm:$0xff]  ;;  %v456_v51 = vld [vmem:[%s2159_s3 + $0x8] sm:$0xff]  ;;  %v457_v52 = vld [vmem:[%s2159_s3 + $0x10] sm:$0xff]  ;;  %vm380_vm3 = vcmp.eq.s32.totalorder %v374_v54, %v1950_v55  ;;  %vm382_vm9 = vcmp.eq.s32.totalorder %v376_v56, %v1950_v55  ;;  %s1323_s18 = sshll.u32 %s1817_s17, 4  ;;  %s1324_s18 = int_to_ptr.vmem [resolvable:$true] %s1323_s18 }
   0x7   :  { %1645 = vmatprep.subr.msk.bf16.mxu0 %vm1887_vm1, %v1643_v20  ;;  %v458_v53 = vld [vmem:[%s2159_s3 + $0x18] sm:$0xff]  ;;  %vm381_vm10 = vcmp.eq.s32.totalorder %v375_v58, %v1950_v55  ;;  %s1766_s19 = scalar_lea.vmem %s1324_s18, 512  ;;  %p1771_p1 = scmp.lt.s32.totalorder %s1324_s18, %s1324_s18 }
   0x8   :  { %v38_v10 = vmul.f32 %v35_v9, %v26_v4  ;;  %v36_v11 = vmul.f32 %v35_v9, %v24_v6  ;;  %v39_v12 = vmul.f32 %v35_v9, %v27_v7  ;;  %v37_v13 = vmul.f32 %v35_v9, %v25_v8  ;;  %1648 = vmatpush3.bf16.xpose.msk.msra.mxu0 %vm1887_vm1, %v1643_v20  ;;  %p1767_p0 = scmp.ne.s32.totalorder %s1324_s18, %s1766_s19  ;;  %p1772_p2 = scmp.lt.s32.totalorder %s1766_s19, %s1766_s19 }
   0x9   :  { %1651 = vmatprep.subr.msk.bf16.mxu0 %vm1887_vm1, %v1649_v24 }
   0xa   :  { %v47_v14 = vsel %vm40_vm0, %v38_v10, 0.0  ;;  %v41_v15 = vsel %vm40_vm0, %v36_v11, 0.0  ;;  %v50_v16 = vsel %vm40_vm0, %v39_v12, 0.0  ;;  %v44_v17 = vsel %vm40_vm0, %v37_v13, 0.0  ;;  %p1773_p3 = por %p1772_p2, %p1771_p1 }
   0xb   :  { %48 = vadd.xlane.f32.xlu1 %v47_v14  ;;  %42 = vadd.xlane.f32.xlu0 %v41_v15 }
   0xc   :  { %p1774_p4 = pnand %p1773_p3, %p1767_p0 }
   0xf   :  { %51 = vadd.xlane.f32.xlu1 %v50_v16  ;;  %45 = vadd.xlane.f32.xlu0 %v44_v17 }
  0x10   :  { %1654 = vmatpush3.bf16.xpose.msk.msra.mxu0 %vm1887_vm1, %v1649_v24 }
  0x98   :  { %v49_v25 = vpop.xlane.xlu1 %48  ;;  %v43_v26 = vpop.xlane.xlu0 %42 }
  0x99   :  { %1744 = vrsqrt.f32 %v43_v26 }
  0x9a   :  { %1746 = vrsqrt.f32 %v49_v25 }
  0x9c   :  { %v52_v27 = vpop.xlane.xlu1 %51  ;;  %v46_v28 = vpop.xlane.xlu0 %45 }
  0x9d   :  { %1748 = vrsqrt.f32 %v52_v27 }
  0x9e   :  { %1750 = vrsqrt.f32 %v46_v28  ;;  %v664_v28 = vld [vmem:[%s2156_s0 + $0x18] sm:$0xff] }
  0xa3   :  { %v1745_v29 = vpop.eup %1744 }
  0xa4   :  { %v1747_v30 = vpop.eup %1746  ;;  %v61_v31 = vmul.f32 %v1745_v29, %v24_v6  ;;  %v57_v32 = vmul.f32 %v1745_v29, %v36_v11  ;;  %v665_v29 = vld [vmem:[%s2156_s0 + $0x20] sm:$0xff] }
  0xa5   :  { %v63_v35 = vmul.f32 %v1747_v30, %v26_v4  ;;  %v59_v38 = vmul.f32 %v1747_v30, %v38_v10  ;;  %v1687_v30 = vpack.c.bf16 %v665_v29, %v664_v28 }
  0xa6   :  { %1498 = vmatprep.mubr.msk.f32.mxu0 %vm40_vm0, %v61_v31  ;;  %1512 = vmatprep.mubr.msk.f32.mxu1 %vm40_vm0, %v57_v32 }
  0xa7   :  { %v1749_v33 = vpop.eup %1748 }
  0xa8   :  { %v1751_v34 = vpop.eup %1750  ;;  %v60_v39 = vmul.f32 %v1749_v33, %v39_v12  ;;  %v64_v41 = vmul.f32 %v1749_v33, %v27_v7 }
  0xa9   :  { %v58_v36 = vmul.f32 %v1751_v34, %v37_v13  ;;  %v62_v37 = vmul.f32 %v1751_v34, %v25_v8 }
  0xaa   :  { %v1673_v42 = vpack.c.bf16 %v60_v39, %v59_v38 }
  0xab   :  { %v1667_v40 = vpack.c.bf16 %v58_v36, %v57_v32  ;;  %1499 = vmatmul.mubr.msk.f32.vlgmr.msra.gmra.mrb[0].mxu0 %vm40_vm0, %v62_v37 }
  0xac   :  { %1501 = vmatprep.mubr.msk.f32.mxu0 %vm40_vm0, %v63_v35 }
  0xad   :  { %1669 = vmatprep.subr.msk.bf16.mxu0 %vm1887_vm1, %v1667_v40 }
  0xae   :  { %1672 = vmatpush3.bf16.xpose.msk.msra.mxu0 %vm1887_vm1, %v1667_v40 }
  0xaf   :  { %1502 = vmatmul.mubr.msk.f32.gmra.mrb[2].mxu0 %vm40_vm0, %v64_v41  ;;  %1675 = vmatprep.subr.msk.bf16.mxu0 %vm1887_vm1, %v1673_v42 }
  0xb6   :  { %1678 = vmatpush3.bf16.xpose.msk.msra.mxu0 %vm1887_vm1, %v1673_v42 }
  0xb7   :  { %1688 = vmatprep.subr.bf16.mxu0 %v1687_v30 }
 0x17e   :  { %v1500_v43 = vpop.f32.mrb[0].mxu0 }
 0x17f   :  { %v155_v44 = vpop.f32.mrb[1].mxu0 }
 0x180   :  { %1526 = vmatprep.mubr.msk.f32.mxu0 %vm40_vm0, %v155_v44  ;;  %v1655_v45 = vpack.c.bf16 %v1500_v43, %v155_v44 }
 0x181   :  { %1527 = vmatmul.mubr.msk.f32.vlgmr.msra.gmra.mrb[4].mxu0 %vm40_vm0, %v1500_v43 }
 0x182   :  { %v1503_v46 = vpop.f32.mrb[2].mxu0  ;;  %1657 = vmatprep.subr.msk.bf16.mxu1 %vm1887_vm1, %v1655_v45  ;;  %1690 = vmatpush3.bf16.msra.mxu0 %v1687_v30 }
 0x183   :  { %v165_v47 = vpop.f32.mrb[3].mxu0  ;;  %1660 = vmatpush3.bf16.xpose.msk.msra.mxu1 %vm1887_vm1, %v1655_v45 }
 0x184   :  { %v1661_v48 = vpack.c.bf16 %v1503_v46, %v165_v47  ;;  %1529 = vmatprep.mubr.msk.f32.mxu0 %vm40_vm0, %v165_v47 }
 0x185   :  { %1530 = vmatmul.mubr.msk.f32.gmra.mrb[6].mxu0 %vm40_vm0, %v1503_v46 }
 0x186   :  { %1663 = vmatprep.subr.msk.bf16.mxu1 %vm1887_vm1, %v1661_v48 }
 0x18b   :  { %1666 = vmatpush3.bf16.xpose.msk.msra.mxu1 %vm1887_vm1, %v1661_v48 }
 0x18c   :  { %1532 = vmatprep.subr.mxu1 %v459_v49 }
 0x192   :  { %1513 = vmatmul.mubr.msk.f32.vlgmr.msra.gmra.mrb[0].mxu1 %vm40_vm0, %v58_v36 }
 0x193   :  { %1515 = vmatprep.mubr.msk.f32.mxu1 %vm40_vm0, %v59_v38  ;;  %1533 = vmatpush3.msra.mxu1 %v459_v49 }
 0x196   :  { %1516 = vmatmul.mubr.msk.f32.gmra.mrb[2].mxu1 %vm40_vm0, %v60_v39 }
 0x197   :  { %1534 = vmatprep.mubr.msk.f32.mxu1 %vm460_vm2, %v455_v50 }
 0x19a   :  { %1535 = vmatmul.mubr.msk.f32.vlgmr.msra.gmra.mrb[4].mxu1 %vm460_vm2, %v456_v51 }
 0x19b   :  { %1537 = vmatprep.mubr.msk.f32.mxu1 %vm460_vm2, %v457_v52 }
 0x19e   :  { %1538 = vmatmul.mubr.msk.f32.gmra.mrb[6].mxu1 %vm460_vm2, %v458_v53 }
 0x254   :  { %v1528_v57 = vpop.f32.mrb[4].mxu0 }
 0x255   :  { %vm396_vm5 = vcmp.eq.f32.partialorder %v1528_v57, 0.0  ;;  %v349_v59 = vpop.f32.mrb[5].mxu0 }
 0x256   :  { %vm395_vm6 = vcmp.eq.f32.partialorder %v349_v59, 0.0  ;;  %vm400_vm7 = vmand %vm380_vm3, %vm396_vm5 }
 0x257   :  { %v1959_v60 = vsel %vm400_vm7, 1.0, %v1528_v57  ;;  %vm399_vm8 = vmand %vm379_vm4, %vm395_vm6 }
 0x258   :  { %v1531_v61 = vpop.f32.mrb[6].mxu0  ;;  %v410_v62 = vsel %vm40_vm0, %v1959_v60, 0.0  ;;  %v1967_v63 = vsel %vm399_vm8, 1.0, %v349_v59 }
 0x259   :  { %vm398_vm11 = vcmp.eq.f32.partialorder %v1531_v61, 0.0  ;;  %411 = vadd.xlane.f32.xlu1 %v410_v62  ;;  %v359_v0 = vpop.f32.mrb[7].mxu0  ;;  %v407_v1 = vsel %vm40_vm0, %v1967_v63, 0.0 }
 0x25a   :  { %vm397_vm12 = vcmp.eq.f32.partialorder %v359_v0, 0.0  ;;  %408 = vadd.xlane.f32.xlu0 %v407_v1  ;;  %vm402_vm13 = vmand %vm382_vm9, %vm398_vm11 }
 0x25b   :  { %v1974_v2 = vsel %vm402_vm13, 1.0, %v1531_v61  ;;  %vm401_vm14 = vmand %vm381_vm10, %vm397_vm12  ;;  %v667_v61 = vld [vmem:[%s2156_s0 + $0x30] sm:$0xff]  ;;  %vm1815_vm13 = vmmov 0  }
 0x25c   :  { %v416_v4 = vsel %vm40_vm0, %v1974_v2, 0.0  ;;  %v1980_v5 = vsel %vm401_vm14, 1.0, %v359_v0 }
 0x25d   :  { %417 = vadd.xlane.f32.xlu1 %v416_v4  ;;  %v413_v6 = vsel %vm40_vm0, %v1980_v5, 0.0 }
 0x25e   :  { %414 = vadd.xlane.f32.xlu0 %v413_v6 }
 0x265   :  { %v1514_v7 = vpop.f32.mrb[0].mxu1 }
 0x266   :  { %369 = vst.msk [vmem:[%s2160_s4 + $0x8] sm:$0xff] %vm40_vm0, %v1514_v7  ;;  %vm384_vm15 = vcmp.eq.f32.partialorder %v1514_v7, 0.0  ;;  %v264_v8 = vpop.f32.mrb[1].mxu1 }
 0x267   :  { %vm388_vm1 = vmand %vm380_vm3, %vm384_vm15  ;;  %368 = vst.msk [vmem:[%s2160_s4] sm:$0xff] %vm40_vm0, %v264_v8  ;;  %vm383_vm2 = vcmp.eq.f32.partialorder %v264_v8, 0.0 }
 0x268   :  { %v392_v9 = vsel %vm388_vm1, 1.0, %v1514_v7  ;;  %vm387_vm5 = vmand %vm379_vm4, %vm383_vm2  ;;  %vm1302_vm2 = vcmask 25600  }
 0x269   :  { %v432_v10 = vsel %vm40_vm0, %v392_v9, 0.0  ;;  %v391_v11 = vsel %vm387_vm5, 1.0, %v264_v8  ;;  %v1517_v12 = vpop.f32.mrb[2].mxu1 }
 0x26a   :  { %v431_v13 = vsel %vm40_vm0, %v391_v11, 0.0  ;;  %371 = vst.msk [vmem:[%s2160_s4 + $0x18] sm:$0xff] %vm40_vm0, %v1517_v12  ;;  %vm386_vm3 = vcmp.eq.f32.partialorder %v1517_v12, 0.0  ;;  %v274_v14 = vpop.f32.mrb[3].mxu1 }
 0x26b   :  { %v433_v15 = vadd.f32 %v432_v10, %v431_v13  ;;  %vm390_vm6 = vmand %vm382_vm9, %vm386_vm3  ;;  %370 = vst.msk [vmem:[%s2160_s4 + $0x10] sm:$0xff] %vm40_vm0, %v274_v14  ;;  %vm385_vm4 = vcmp.eq.f32.partialorder %v274_v14, 0.0  ;;  %v859_v13 = vld [vmem:[%s2156_s0 + $0x40] sm:$0xff] }
 0x26c   :  { %v394_v16 = vsel %vm390_vm6, 1.0, %v1517_v12  ;;  %vm389_vm7 = vmand %vm381_vm10, %vm385_vm4 }
 0x26d   :  { %v393_v17 = vsel %vm389_vm7, 1.0, %v274_v14  ;;  %v1536_v18 = vpop.f32.mrb[4].mxu1  ;;  %v436_v23 = vsel %vm40_vm0, %v394_v16, 0.0  ;;  %v860_v14 = vld [vmem:[%s2156_s0 + $0x48] sm:$0xff] }
 0x26e   :  { %v434_v19 = vsel %vm40_vm0, %v393_v17, 0.0  ;;  %v539_v20 = vpop.f32.mrb[5].mxu1 }
 0x26f   :  { %v435_v21 = vadd.f32 %v434_v19, %v433_v15  ;;  %v1679_v22 = vpack.c.bf16 %v1536_v18, %v539_v20  ;;  %v1703_v15 = vpack.c.bf16 %v860_v14, %v859_v13  ;;  %v1223_v13 = vld [vmem:[%s2156_s0 + $0xa8] sm:$0xff] }
 0x271   :  { %v437_v24 = vadd.f32 %v436_v23, %v435_v21  ;;  %v1539_v25 = vpop.f32.mrb[6].mxu1  ;;  %1680 = vmatprep.subr.bf16.mxu1 %v1679_v22  ;;  %v862_v23 = vld [vmem:[%s2156_s0 + $0x58] sm:$0xff] }
 0x272   :  { %v549_v26 = vpop.f32.mrb[7].mxu1  ;;  %1682 = vmatpush3.bf16.msra.mxu1 %v1679_v22  ;;  %v861_v22 = vld [vmem:[%s2156_s0 + $0x50] sm:$0xff] }
 0x273   :  { %v1683_v27 = vpack.c.bf16 %v1539_v25, %v549_v26  ;;  %v438_v31 = vrot.slane %v437_v24, 4  ;;  %v1387_v25 = vld [vmem:[%s2156_s0 + $0x38] ss:$0 sm:$0xff] }
 0x275   :  { %1684 = vmatprep.subr.bf16.mxu1 %v1683_v27  ;;  %v439_v32 = vadd.f32 %v438_v31, %v437_v24  ;;  %v1707_v24 = vpack.c.bf16 %v862_v23, %v861_v22 }
 0x276   :  { %1686 = vmatpush3.bf16.msra.mxu1 %v1683_v27 }
 0x277   :  { %v440_v33 = vrot.slane %v439_v32, 2 }
 0x279   :  { %v441_v34 = vadd.f32 %v440_v33, %v439_v32 }
 0x27b   :  { %v442_v35 = vrot.slane %v441_v34, 1 }
 0x27d   :  { %v443_v36 = vadd.f32 %v442_v35, %v441_v34 }
 0x27f   :  { %1752 = vrsqrt.f32 %v443_v36  ;;  %vm444_vm10 = vcmp.eq.f32.partialorder %v443_v36, 0.0 }
 0x289   :  { %v1753_v41 = vpop.eup %1752 }
 0x28a   :  { %v446_v49 = vsel %vm444_vm10, 0.0, %v1753_v41 }
 0x2e6   :  { %v412_v37 = vpop.xlane.xlu1 %411 }
 0x2e7   :  { %1754 = vrsqrt.f32 %v412_v37  ;;  %v409_v38 = vpop.xlane.xlu0 %408  ;;  %vm420_vm8 = vcmp.eq.f32.partialorder %v412_v37, 0.0 }
 0x2e8   :  { %1756 = vrsqrt.f32 %v409_v38  ;;  %vm419_vm9 = vcmp.eq.f32.partialorder %v409_v38, 0.0 }
 0x2ea   :  { %v418_v39 = vpop.xlane.xlu1 %417 }
 0x2eb   :  { %1758 = vrsqrt.f32 %v418_v39  ;;  %v415_v40 = vpop.xlane.xlu0 %414  ;;  %vm422_vm11 = vcmp.eq.f32.partialorder %v418_v39, 0.0 }
 0x2ec   :  { %1760 = vrsqrt.f32 %v415_v40  ;;  %vm421_vm12 = vcmp.eq.f32.partialorder %v415_v40, 0.0 }
 0x2f1   :  { %v1755_v42 = vpop.eup %1754 }
 0x2f2   :  { %v1757_v43 = vpop.eup %1756  ;;  %v428_v44 = vsel %vm420_vm8, 0.0, %v1755_v42 }
 0x2f3   :  { %v448_v45 = vmul.f32 %v428_v44, %v1959_v60  ;;  %v427_v46 = vsel %vm419_vm9, 0.0, %v1757_v43  ;;  %v666_v60 = vld [vmem:[%s2156_s0 + $0x28] sm:$0xff]  ;;  %v1814_v44 = vmov 0.0|0.0  }
 0x2f4   :  { %v447_v47 = vmul.f32 %v427_v46, %v1967_v63  ;;  %v1691_v62 = vpack.c.bf16 %v667_v61, %v666_v60  ;;  %v1378_v63 = vld [vmem:[%s2156_s0 + $0x10] ss:$0 sm:$0xff]  ;;  %v1138_v46 = vld [vmem:[%s2156_s0 + $0x68] sm:$0xff] }
 0x2f5   :  { %v1759_v48 = vpop.eup %1758  ;;  %v2021_v53 = vmul.f32 %v448_v45, %v446_v49  ;;  %v1816_v45 = vmov 0.0  }
 0x2f6   :  { %v1761_v50 = vpop.eup %1760  ;;  %v451_v51 = vmul.f32 %v447_v47, %v446_v49  ;;  %v430_v52 = vsel %vm422_vm11, 0.0, %v1759_v48  ;;  %1692 = vmatprep.subr.bf16.mxu0 %v1691_v62  ;;  %v1139_v47 = vld [vmem:[%s2156_s0 + $0x70] sm:$0xff]  ;;  %v1140_v48 = vld [vmem:[%s2156_s0 + $0x78] sm:$0xff] }
 0x2f7   :  { %v450_v54 = vmul.f32 %v430_v52, %v1974_v2  ;;  %v429_v56 = vsel %vm421_vm12, 0.0, %v1761_v50  ;;  %1694 = vmatpush3.bf16.msra.mxu0 %v1691_v62  ;;  %v1141_v50 = vld [vmem:[%s2156_s0 + $0x80] sm:$0xff] }
 0x2f8   :  { %v449_v57 = vmul.f32 %v429_v56, %v1980_v5  ;;  %1548 = vmatprep.mubr.msk.f32.mxu1 %vm40_vm0, %v451_v51  ;;  %1704 = vmatprep.subr.bf16.mxu0 %v1703_v15  ;;  %v1396_v52 = vld [vmem:[%s2156_s0 + $0x60] ss:$0 sm:$0xff] }
 0x2f9   :  { %1549 = vmatmul.mubr.msk.f32.vlgmr.msra.gmra.mrb[8].mxu1 %vm40_vm0, %v2021_v53  ;;  %v2030_v59 = vmul.f32 %v450_v54, %v446_v49 }
 0x2fa   :  { %v2028_v58 = vmul.f32 %v449_v57, %v446_v49  ;;  %v1726_v49 = vpack.c.bf16 %v1139_v47, %v1138_v46 }
 0x2fc   :  { %1551 = vmatprep.mubr.msk.f32.mxu1 %vm40_vm0, %v2028_v58 }
 0x2fd   :  { %1552 = vmatmul.mubr.msk.f32.gmra.mrb[10].mxu1 %vm40_vm0, %v2030_v59 }
 0x2fe   :  { %1576 = vmatprep.mubr.msk.f32.mxu1 %vm40_vm0, %v451_v51 }
 0x3cc   :  { %v1550_v0 = vpop.f32.mrb[8].mxu1 }
 0x3cd   :  { %v647_v1 = vadd.f32 %v1550_v0, %v1378_v63  ;;  %v641_v2 = vpop.f32.mrb[9].mxu1 }
 0x3ce   :  { %v642_v4 = vadd.f32 %v1378_v63, %v641_v2 }
 0x3cf   :  { %v661_v7 = vmax.f32 %v647_v1, 0.0 }
 0x3d0   :  { %v660_v5 = vmax.f32 %v642_v4, 0.0  ;;  %v1553_v6 = vpop.f32.mrb[10].mxu1 }
 0x3d1   :  { %v657_v8 = vadd.f32 %v1553_v6, %v1378_v63  ;;  %v651_v9 = vpop.f32.mrb[11].mxu1 }
 0x3d2   :  { %v652_v10 = vadd.f32 %v1378_v63, %v651_v9  ;;  %1562 = vmatprep.mubr.msk.f32.mxu0 %vm40_vm0, %v660_v5 }
 0x3d3   :  { %1563 = vmatmul.mubr.msk.f32.vlgmr.msra.gmra.mrb[8].mxu0 %vm40_vm0, %v661_v7  ;;  %v663_v12 = vmax.f32 %v657_v8, 0.0  ;;  %v1221_v8 = vld [vmem:[%s2156_s0 + $0x98] sm:$0xff] }
 0x3d4   :  { %v662_v11 = vmax.f32 %v652_v10, 0.0  ;;  %1706 = vmatpush3.bf16.msra.mxu0 %v1703_v15  ;;  %v1402_v15 = vld [vmem:[%s2156_s0 + $0x88] ss:$0 sm:$0xff] }
 0x3d5   :  { %1708 = vmatprep.subr.bf16.mxu0 %v1707_v24 }
 0x3d6   :  { %1565 = vmatprep.mubr.msk.f32.mxu0 %vm40_vm0, %v662_v11 }
 0x3d7   :  { %1566 = vmatmul.mubr.msk.f32.gmra.mrb[10].mxu0 %vm40_vm0, %v663_v12  ;;  %v1222_v12 = vld [vmem:[%s2156_s0 + $0xa0] sm:$0xff] }
 0x3d8   :  { %1710 = vmatpush3.bf16.msra.mxu0 %v1707_v24  ;;  %v1735_v14 = vpack.c.bf16 %v1223_v13, %v1222_v12 }
 0x3d9   :  { %1719 = vmatprep.subr.bf16.mxu0 %v1814_v44 }
 0x4a6   :  { %v1564_v16 = vpop.f32.mrb[8].mxu0 }
 0x4a7   :  { %v746_v17 = vpop.f32.mrb[9].mxu0 }
 0x4a8   :  { %v1695_v18 = vpack.c.bf16 %v1564_v16, %v746_v17 }
 0x4aa   :  { %v1567_v19 = vpop.f32.mrb[10].mxu0  ;;  %1696 = vmatprep.subr.bf16.mxu1 %v1695_v18 }
 0x4ab   :  { %v756_v20 = vpop.f32.mrb[11].mxu0  ;;  %1698 = vmatpush3.bf16.msra.mxu1 %v1695_v18 }
 0x4ac   :  { %v1699_v21 = vpack.c.bf16 %v1567_v19, %v756_v20  ;;  %v1404_v19 = vld [vmem:[%s2156_s0 + $0xb0] ss:$0 sm:$0xff] }
 0x4ae   :  { %1700 = vmatprep.subr.bf16.mxu1 %v1699_v21 }
 0x4af   :  { %1702 = vmatpush3.bf16.msra.mxu1 %v1699_v21 }
 0x4b2   :  { %1577 = vmatmul.mubr.msk.f32.vlgmr.msra.gmra.mrb[12].mxu1 %vm40_vm0, %v2021_v53 }
 0x4b3   :  { %1579 = vmatprep.mubr.msk.f32.mxu1 %vm40_vm0, %v2028_v58 }
 0x4b6   :  { %1580 = vmatmul.mubr.msk.f32.gmra.mrb[14].mxu1 %vm40_vm0, %v2030_v59 }
 0x4b7   :  { %1604 = vmatprep.mubr.msk.f32.mxu1 %vm40_vm0, %v451_v51  ;;  %v1729_v51 = vpack.c.bf16 %v1141_v50, %v1140_v48 }
 0x585   :  { %v1578_v26 = vpop.f32.mrb[12].mxu1 }
 0x586   :  { %v842_v27 = vadd.f32 %v1578_v26, %v1387_v25  ;;  %v836_v28 = vpop.f32.mrb[13].mxu1 }
 0x587   :  { %v837_v29 = vadd.f32 %v1387_v25, %v836_v28 }
 0x588   :  { %v856_v32 = vmax.f32 %v842_v27, 0.0 }
 0x589   :  { %v855_v30 = vmax.f32 %v837_v29, 0.0  ;;  %v1581_v31 = vpop.f32.mrb[14].mxu1 }
 0x58a   :  { %v852_v33 = vadd.f32 %v1581_v31, %v1387_v25  ;;  %v846_v34 = vpop.f32.mrb[15].mxu1 }
 0x58b   :  { %v847_v35 = vadd.f32 %v1387_v25, %v846_v34  ;;  %1590 = vmatprep.mubr.msk.f32.mxu0 %vm40_vm0, %v855_v30 }
 0x58c   :  { %1591 = vmatmul.mubr.msk.f32.vlgmr.msra.gmra.mrb[12].mxu0 %vm40_vm0, %v856_v32  ;;  %v858_v37 = vmax.f32 %v852_v33, 0.0 }
 0x58d   :  { %v857_v36 = vmax.f32 %v847_v35, 0.0 }
 0x58f   :  { %1593 = vmatprep.mubr.msk.f32.mxu0 %vm40_vm0, %v857_v36 }
 0x590   :  { %1594 = vmatmul.mubr.msk.f32.gmra.mrb[14].mxu0 %vm40_vm0, %v858_v37 }
 0x591   :  { %1618 = vmatprep.mubr.msk.f32.mxu0 %vm1815_vm13, %v1816_v45 }
 0x65f   :  { %v1592_v38 = vpop.f32.mrb[12].mxu0 }
 0x660   :  { %v941_v39 = vpop.f32.mrb[13].mxu0 }
 0x661   :  { %v1711_v40 = vpack.c.bf16 %v1592_v38, %v941_v39 }
 0x663   :  { %v1595_v41 = vpop.f32.mrb[14].mxu0  ;;  %1712 = vmatprep.subr.bf16.mxu1 %v1711_v40 }
 0x664   :  { %v951_v42 = vpop.f32.mrb[15].mxu0  ;;  %1714 = vmatpush3.bf16.msra.mxu1 %v1711_v40 }
 0x665   :  { %v1715_v43 = vpack.c.bf16 %v1595_v41, %v951_v42 }
 0x667   :  { %1716 = vmatprep.subr.bf16.mxu1 %v1715_v43 }
 0x668   :  { %1718 = vmatpush3.bf16.msra.mxu1 %v1715_v43 }
 0x669   :  { %1725 = vmatprep.subr.bf16.mxu1 %v1814_v44 }
 0x66b   :  { %1605 = vmatmul.mubr.msk.f32.vlgmr.msra.gmra.mrb[16].mxu1 %vm40_vm0, %v2021_v53  ;;  %v1060_v53 = vadd.s32 1, %v1860_v3 }
 0x66c   :  { %1607 = vmatprep.mubr.msk.f32.mxu1 %vm40_vm0, %v2028_v58  ;;  %1727 = vmatpush3.bf16.msra.mxu1 %v1726_v49 }
 0x66d   :  { %1728 = vmatprep.subr.bf16.mxu1 %v1814_v44  ;;  %v1061_v60 = vmul.u32 16, %v1060_v53 }
 0x66f   :  { %1608 = vmatmul.mubr.msk.f32.gmra.mrb[18].mxu1 %vm40_vm0, %v2030_v59  ;;  %v1058_v59 = vmul.u32 16, %v1860_v3  ;;  %vm1062_vm15 = vcmp.lt.s32.totalorder %v1950_v55, %v1061_v60 }
 0x670   :  { %1629 = vmatprep.mubr.msk.f32.mxu1 %vm1815_vm13, %v1816_v45  ;;  %1730 = vmatpush3.bf16.msra.mxu1 %v1729_v51 }
 0x671   :  { %vm1059_vm14 = vcmp.ge.s32.totalorder %v1950_v55, %v1058_v59  ;;  %v1220_v55 = vld [vmem:[%s2156_s0 + $0x90] sm:$0xff] }
 0x672   :  { %vm1063_vm1 = vmand %vm1059_vm14, %vm1062_vm15  ;;  %v1732_v9 = vpack.c.bf16 %v1221_v8, %v1220_v55 }
 0x673   :  { %v1064_v7 = vsel %vm1063_vm1, 0.0625, %v1816_v45 }
 0x73e   :  { %v1606_v54 = vpop.f32.mrb[16].mxu1 }
 0x73f   :  { %v1037_v56 = vadd.f32 %v1606_v54, %v1396_v52  ;;  %v1031_v57 = vpop.f32.mrb[17].mxu1 }
 0x740   :  { %v1032_v58 = vadd.f32 %v1396_v52, %v1031_v57 }
 0x741   :  { %v1051_v61 = vmax.f32 %v1037_v56, 0.0  ;;  %1055 = vst.msk [vmem:[#allocation2 + $0x8] sm:$0xff] %vm40_vm0, %v1037_v56 }
 0x742   :  { %v1050_v62 = vmax.f32 %v1032_v58, 0.0  ;;  %1054 = vst.msk [vmem:[#allocation2] sm:$0xff] %vm40_vm0, %v1032_v58  ;;  %v1609_v63 = vpop.f32.mrb[18].mxu1 }
 0x743   :  { %v1047_v0 = vadd.f32 %v1609_v63, %v1396_v52  ;;  %v1041_v1 = vpop.f32.mrb[19].mxu1 }
 0x744   :  { %v1720_v2 = vpack.c.bf16 %v1051_v61, %v1050_v62  ;;  %v1042_v4 = vadd.f32 %v1396_v52, %v1041_v1 }
 0x745   :  { %v1053_v5 = vmax.f32 %v1047_v0, 0.0  ;;  %1057 = vst.msk [vmem:[#allocation2 + $0x18] sm:$0xff] %vm40_vm0, %v1047_v0 }
 0x746   :  { %v1052_v3 = vmax.f32 %v1042_v4, 0.0  ;;  %1056 = vst.msk [vmem:[#allocation2 + $0x10] sm:$0xff] %vm40_vm0, %v1042_v4  ;;  %1721 = vmatpush3.bf16.msra.mxu0 %v1720_v2 }
 0x747   :  { %1722 = vmatprep.subr.bf16.mxu0 %v1814_v44 }
 0x748   :  { %v1723_v6 = vpack.c.bf16 %v1053_v5, %v1052_v3 }
 0x74a   :  { %1724 = vmatpush3.bf16.msra.mxu0 %v1723_v6 }
 0x74b   :  { %1731 = vmatprep.subr.bf16.mxu0 %v1814_v44 }
 0x74d   :  { %1619 = vmatmul.mubr.msk.f32.vlgmr.msra.gmra.mrb[16].mxu0 %vm40_vm0, %v1064_v7 }
 0x74e   :  { %1640 = vmatprep.mubr.msk.f32.mxu0 %vm1815_vm13, %v1816_v45  ;;  %1733 = vmatpush3.bf16.msra.mxu0 %v1732_v9 }
 0x74f   :  { %1734 = vmatprep.subr.bf16.mxu0 %v1814_v44 }
 0x752   :  { %1736 = vmatpush3.bf16.msra.mxu0 %v1735_v14 }
 0x820   :  { %v1134_v10 = vpop.f32.mrb[16].mxu0 }
 0x821   :  { %v1620_v11 = vpop.f32.mrb[17].mxu0  ;;  %1630 = vmatmul.mubr.msk.f32.vlgmr.msra.gmra.mrb[20].mxu1 %vm40_vm0, %v1134_v10 }
 0x8f4   :  { %v1216_v16 = vpop.f32.mrb[20].mxu1 }
 0x8f5   :  { %v1217_v17 = vadd.f32 %v1402_v15, %v1216_v16  ;;  %v1631_v18 = vpop.f32.mrb[21].mxu1 }
 0x8f7   :  { %1641 = vmatmul.mubr.msk.f32.vlgmr.msra.gmra.mrb[18].mxu0 %vm40_vm0, %v1217_v17 }
 0x9ca   :  { %v1298_v20 = vpop.f32.mrb[18].mxu0 }
 0x9cb   :  { %v1299_v21 = vadd.f32 %v1404_v19, %v1298_v20  ;;  %v1642_v22 = vpop.f32.mrb[19].mxu0 }
 0x9cd   :  { %v1303_v23 = vsel %vm1302_vm2, %v1299_v21, -inf }
 0x9ce   :  { %1304 = vmax.xlane.f32.xlu0 %v1303_v23 }
 0xa5b   :  { %v1305_v24 = vpop.xlane.xlu0 %1304 }
 0xa5c   :  { %v1306_v25 = vsub.f32 %v1299_v21, %v1305_v24 }
 0xa5e   :  { %v1307_v26 = vmul.f32 1.442695, %v1306_v25 }
 0xa60   :  { %1762 = vpow2.f32 %v1307_v26 }
 0xa6a   :  { %v1763_v27 = vpop.eup %1762 }
 0xa6b   :  { %v1309_v28 = vsel %vm1302_vm2, %v1763_v27, 0.0 }
 0xa6c   :  { %1310 = vadd.xlane.f32.xlu1 %v1309_v28 }
 0xa6d   :  { %1777 = shalt.err (!%p1774_p4)
}
 0xa6e   :  { %s1778_s21 = scalar_lea.hbm %s2161_s5, 512 }
 0xa6f   :  { %p1779_p5 = scmp.ne.s32.totalorder %s2161_s5, %s1778_s21  ;;  %p1782_p6 = scmp.lt.u32.totalorder %s1778_s21, %s2161_s5 }
 0xa71   :  { %p1784_p7 = pnand %p1782_p6, %p1779_p5 }
 0xa73   :  { %1787 = shalt.err (!%p1784_p7)
}
 0xa74   :  { %s1818_s25 = smov 128   ;;  %s1819_s26 = smov 8  }
 0xa75   :  { %1329 = dma.vmem_to_hbm [thread:$0]  %s1324_s18, 512, %s2161_s5, [#allocation3], %s1818_s25, %s1818_s25, %s1819_s26  }
 0xa76   :  { %s1820_s29 = smov [#allocation4]  }
 0xa77   :  { %s1336_s4 = sshll.u32 %s1820_s29, 4  ;;  %s1337_s4 = int_to_ptr.vmem [resolvable:$true] %s1336_s4 }
 0xa78   :  { %s1788_s30 = scalar_lea.vmem %s1337_s4, 32  ;;  %p1793_p9 = scmp.lt.s32.totalorder %s1337_s4, %s1337_s4 }
 0xa79   :  { %p1789_p8 = scmp.ne.s32.totalorder %s1337_s4, %s1788_s30  ;;  %p1794_p10 = scmp.lt.s32.totalorder %s1788_s30, %s1788_s30 }
 0xa7b   :  { %p1795_p11 = por %p1794_p10, %p1793_p9 }
 0xa7d   :  { %p1796_p12 = pnand %p1795_p11, %p1789_p8 }
 0xaf9   :  { %v1311_v29 = vpop.xlane.xlu1 %1310 }
 0xafa   :  { %1764 = vlog2.f32 %v1311_v29 }
 0xb04   :  { %v1765_v30 = vpop.eup %1764 }
 0xb05   :  { %v1313_v31 = vmul.f32 0.6931472, %v1765_v30 }
 0xb07   :  { %v1314_v32 = vsub.f32 %v1306_v25, %v1313_v31 }
 0xb09   :  { %1315 = vst.msk [vmem:[#allocation4] sm:$0x3] %vm1302_vm2, %v1314_v32 }
 0xb0a   :  { %1799 = shalt.err (!%p1796_p12)
}
 0xb0b   :  { %s1800_s5 = scalar_lea.hbm %s2162_s6, 32 }
 0xb0c   :  { %p1801_p13 = scmp.ne.s32.totalorder %s2162_s6, %s1800_s5  ;;  %p1804_p0 = scmp.lt.u32.totalorder %s1800_s5, %s2162_s6 }
 0xb0e   :  { %p1806_p1 = pnand %p1804_p0, %p1801_p13 }
 0xb10   :  { %1809 = shalt.err (!%p1806_p1)
}
 0xb11   :  { %1339 = dma.vmem_to_hbm [thread:$0]  %s1337_s4, 32, %s2162_s6, [#allocation5]  }
 0xb12   :  { %1810 = dma.done.wait [#allocation3], 512  }
 0xb13   :  { %1811 = vsyncadd [#allocation3], 4294966784 }
 0xb14   :  { %1812 = dma.done.wait [#allocation5], 32  }
 0xb15   :  { %1813 = vsyncadd [#allocation5], 4294967264 }
 0xb16   :  { %1348 = vsyncpa [#allocation3], 1 }
 0xb17   :  { %1349 = vsyncpa [#allocation5], 1 }

</bundles_post_ra>
